<compile_context>
chip_gen: v7x
topology: tpu7x:2x2x1
jax: 0.10.0
libtpu: 0.0.40
codegen_flags: <defaults>
</compile_context>

<pallas_src>
import jax
import jax.numpy as jnp
from jax.experimental import pallas as pl
from jax.experimental.pallas import tpu as pltpu


BN_EPS = 1e-5
LRELU_SLOPE = 0.2


def _leaky_relu(x, slope=LRELU_SLOPE):
    return jnp.where(x > 0, x, slope * x)


def _round_up(x, m):
    return ((x + m - 1) // m) * m


def _conv1_lrelu_conv2(x_ref, w1_ref, b1_ref, w2_ref, c_in):
    """Shared body: Conv2d(c_in, ndf, 1x1)+bias -> LeakyReLU -> Conv2d(ndf, 2*ndf, 1x1).

    Returns the (2*ndf, tile_p) float32 pre-BatchNorm activations.
    """
    x = x_ref[...]                                        # (c_in, tile_p) f32
    w1 = w1_ref[...]                                      # (ndf, c_in)   f32

    # Conv1: K = c_in is tiny, so keep it on the VPU as broadcast FMAs and leave the
    # MXU free for conv2 (per review, folding it into the matmul is not worth it).
    # TODO(synk): a stride-0 sublane-broadcast load (x_ref[pl.ds(c, ndf, stride=0), :])
    # would move the x-row broadcasts onto the vector-load slot if VALU-bound.
    acc = b1_ref[...]                                     # (ndf, 1), broadcasts below
    for c in range(c_in):                                 # static, unrolled
        acc = acc + w1[:, c:c + 1] * x[c:c + 1, :]
    h1 = _leaky_relu(acc)                                 # (ndf, tile_p) f32

    # Conv2 on the MXU: bf16 operands, f32 accumulation.
    return jnp.dot(w2_ref[...], h1.astype(jnp.bfloat16),
                   preferred_element_type=jnp.float32)    # (2*ndf, tile_p) f32


def _make_stats_kernel(c_in, tile_p, p_total, n_tiles):
    """Pass 1: recompute h2 for this tile and emit per-tile partial BN statistics
    (sum and sum-of-squares). No h2 is written to HBM."""
    p_pad = n_tiles * tile_p
    needs_mask = p_pad != p_total
    tail_valid = p_total - (n_tiles - 1) * tile_p         # valid pixels in last tile

    def kernel(x_ref, w1_ref, b1_ref, w2_ref, sum_ref, sq_ref):
        h2 = _conv1_lrelu_conv2(x_ref, w1_ref, b1_ref, w2_ref, c_in)

        if not needs_mask:
            # No padded pixels anywhere: plain unmasked reductions on every tile.
            sum_ref[0, :, :] = jnp.sum(h2, axis=1, keepdims=True)
            sq_ref[0, :, :] = jnp.sum(h2 * h2, axis=1, keepdims=True)
        else:
            i = pl.program_id(0)
            is_last = i == n_tiles - 1

            @pl.when(jnp.logical_not(is_last))
            def _():
                sum_ref[0, :, :] = jnp.sum(h2, axis=1, keepdims=True)
                sq_ref[0, :, :] = jnp.sum(h2 * h2, axis=1, keepdims=True)

            @pl.when(is_last)
            def _():
                # Only the last tile contains padded pixel columns; mask them out so
                # they do not bias the global batch statistics.
                col = jax.lax.broadcasted_iota(jnp.int32, (1, tile_p), 1)
                h2m = jnp.where(col < tail_valid, h2, 0.0)
                sum_ref[0, :, :] = jnp.sum(h2m, axis=1, keepdims=True)
                sq_ref[0, :, :] = jnp.sum(h2m * h2m, axis=1, keepdims=True)

    return kernel


def _make_apply_kernel(c_in):
    """Pass 2: recompute h2 from x, apply folded BatchNorm scale/shift, LeakyReLU,
    then conv3 as an M=1 MXU matmul -> lane-dense (1, tile_p) logits."""

    def kernel(x_ref, w1_ref, b1_ref, w2_ref, scale_ref, shift_ref, w3t_ref, o_ref):
        h2 = _conv1_lrelu_conv2(x_ref, w1_ref, b1_ref, w2_ref, c_in)
        h2n = _leaky_relu(h2 * scale_ref[...] + shift_ref[...])   # (2*ndf, tile_p) f32
        # Conv2d(2*ndf, 1, 1x1, bias=False) on the MXU (bf16 operands, f32 acc):
        # the vex slot is idle in this pass, and this frees the VALU/XLU slots that a
        # sublane reduce would occupy. Output stays a lane-dense (1, tile_p) slab.
        o_ref[...] = jnp.dot(w3t_ref[...], h2n.astype(jnp.bfloat16),
                             preferred_element_type=jnp.float32)

    return kernel


def pixel_discriminator_forward(x_nchw, params, *, tile_p=8192):
    """Run the pixelGAN discriminator. x_nchw: (N, C, H, W) float32 -> (N, 1, H, W)."""
    n, c, h, w = x_nchw.shape
    p = n * h * w
    ndf = params["w1"].shape[0]
    nc2 = 2 * ndf

    # Tile of the pixel (lane) axis: multiple of 128, no larger than needed.
    tile_p = max(128, (tile_p // 128) * 128)
    tile_p = min(tile_p, _round_up(p, 128))
    p_pad = _round_up(p, tile_p)
    n_tiles = p_pad // tile_p

    # NCHW -> (C, P): channels on sublanes, pixels on lanes; pad P to the tile.
    x_cp = jnp.transpose(x_nchw, (1, 0, 2, 3)).reshape(c, p).astype(jnp.float32)
    if p_pad != p:
        x_cp = jnp.pad(x_cp, ((0, 0), (0, p_pad - p)))

    w1 = params["w1"].astype(jnp.float32)                # (ndf, c)
    b1 = params["b1"].astype(jnp.float32)                # (ndf, 1)
    w2_bf16 = params["w2"].astype(jnp.bfloat16)          # (2*ndf, ndf)  MXU operand
    w3t_bf16 = params["w3"].astype(jnp.bfloat16).reshape(nc2)[None, :]   # (1, 2*ndf)
    gamma = params["gamma"].astype(jnp.float32)          # (2*ndf,)
    beta = params["beta"].astype(jnp.float32)            # (2*ndf,)

    const = lambda i: (0, 0)   # weights stay VMEM-resident (same block every step)
    cparams = pltpu.CompilerParams(
        dimension_semantics=("parallel",),
        # tile_p=8192: ~0.5 MiB of double-buffered blocks + O(10 MiB) f32 temporaries;
        # 48 MiB keeps headroom below v7x's 64 MiB physical VMEM per TensorCore.
        vmem_limit_bytes=48 * 1024 * 1024,
    )

    # ---- Pass 1: conv1 + LeakyReLU + conv2 recompute; only tiny partial BN stats out.
    stats_call = pl.pallas_call(
        _make_stats_kernel(c, tile_p, p, n_tiles),
        grid=(n_tiles,),
        in_specs=[
            pl.BlockSpec((c, tile_p), lambda i: (0, i)),
            pl.BlockSpec((ndf, c), const),
            pl.BlockSpec((ndf, 1), const),
            pl.BlockSpec((nc2, ndf), const),
        ],
        out_specs=(
            pl.BlockSpec((1, nc2, 1), lambda i: (i, 0, 0)),
            pl.BlockSpec((1, nc2, 1), lambda i: (i, 0, 0)),
        ),
        out_shape=(
            jax.ShapeDtypeStruct((n_tiles, nc2, 1), jnp.float32),  # partial sum
            jax.ShapeDtypeStruct((n_tiles, nc2, 1), jnp.float32),  # partial sum of sq
        ),
        compiler_params=cparams,
        cost_estimate=pl.CostEstimate(
            flops=2 * p_pad * (c * ndf + ndf * nc2) + 4 * p_pad * nc2,
            transcendentals=0,
            bytes_accessed=4 * c * p_pad + 2 * nc2 * ndf + 8 * n_tiles * nc2,
        ),
    )
    sum_part, sq_part = stats_call(x_cp, w1, b1, w2_bf16)

    # ---- Tiny JAX glue: global batch stats, fold affine into per-channel scale/shift.
    sums = jnp.sum(sum_part, axis=(0, 2))                 # (2*ndf,)
    sqs = jnp.sum(sq_part, axis=(0, 2))                   # (2*ndf,)
    mean = sums / p
    var = jnp.maximum(sqs / p - mean * mean, 0.0)         # biased variance (training mode)
    inv_std = jax.lax.rsqrt(var + BN_EPS)
    scale = (gamma * inv_std).reshape(nc2, 1)
    shift = (beta - mean * gamma * inv_std).reshape(nc2, 1)
    # TODO(synk): PyTorch training-mode BatchNorm also updates running_mean/running_var
    # buffers; those side effects are not modeled here (normalization math only).

    # ---- Pass 2: recompute h2, normalize + LeakyReLU + conv3 -> lane-dense logits.
    apply_call = pl.pallas_call(
        _make_apply_kernel(c),
        grid=(n_tiles,),
        in_specs=[
            pl.BlockSpec((c, tile_p), lambda i: (0, i)),
            pl.BlockSpec((ndf, c), const),
            pl.BlockSpec((ndf, 1), const),
            pl.BlockSpec((nc2, ndf), const),
            pl.BlockSpec((nc2, 1), const),
            pl.BlockSpec((nc2, 1), const),
            pl.BlockSpec((1, nc2), const),
        ],
        out_specs=pl.BlockSpec((1, tile_p), lambda i: (0, i)),
        out_shape=jax.ShapeDtypeStruct((1, p_pad), jnp.float32),
        compiler_params=cparams,
        cost_estimate=pl.CostEstimate(
            flops=2 * p_pad * (c * ndf + ndf * nc2 + nc2) + 4 * p_pad * nc2,
            transcendentals=0,
            bytes_accessed=4 * c * p_pad + 4 * p_pad + 2 * nc2 * ndf,
        ),
    )
    out_flat = apply_call(x_cp, w1, b1, w2_bf16, scale, shift, w3t_bf16)

    # (1, P_pad) -> drop padding -> (N, 1, H, W)
    return out_flat[0, :p].reshape(n, h, w)[:, None, :, :]


def init_params(key, input_nc, ndf=64):
    """Deterministic synthetic parameters. 1x1 conv weights (out, in, 1, 1) are stored
    directly as (out, in) matrices (a 1x1 conv is a per-pixel matmul)."""
    k1, k2, k3, k4, k5, k6 = jax.random.split(key, 6)
    w1 = jax.random.normal(k1, (ndf, input_nc), jnp.float32) * 0.1
    b1 = jax.random.normal(k2, (ndf, 1), jnp.float32) * 0.1
    w2 = jax.random.normal(k3, (2 * ndf, ndf), jnp.float32) * 0.1
    gamma = 1.0 + 0.1 * jax.random.normal(k4, (2 * ndf,), jnp.float32)
    beta = 0.1 * jax.random.normal(k5, (2 * ndf,), jnp.float32)
    w3 = jax.random.normal(k6, (2 * ndf, 1), jnp.float32) * 0.1
    return {"w1": w1, "b1": b1, "w2": w2, "gamma": gamma, "beta": beta, "w3": w3}


def _reference_forward(x_nchw, params, conv2_dtype=None, conv3_dtype=None):
    """Plain-JAX reference of the module math (training-mode BatchNorm).
    conv2_dtype/conv3_dtype = jnp.bfloat16 mirror the kernel's bf16 MXU operands for
    a tight check; None gives the pure f32 math (loose check)."""
    n, c, h, w = x_nchw.shape
    xf = jnp.transpose(x_nchw, (0, 2, 3, 1)).reshape(n * h * w, c)
    h1 = _leaky_relu(xf @ params["w1"].T + params["b1"][:, 0])
    w2 = params["w2"]
    h1m = h1
    if conv2_dtype is not None:
        h1m = h1.astype(conv2_dtype).astype(jnp.float32)
        w2 = w2.astype(conv2_dtype).astype(jnp.float32)
    h2 = h1m @ w2.T
    mu = h2.mean(0)
    var = ((h2 - mu) ** 2).mean(0)
    h2n = (h2 - mu) * jax.lax.rsqrt(var + BN_EPS) * params["gamma"] + params["beta"]
    h2n = _leaky_relu(h2n)
    w3 = params["w3"]
    h2nm = h2n
    if conv3_dtype is not None:
        h2nm = h2n.astype(conv3_dtype).astype(jnp.float32)
        w3 = w3.astype(conv3_dtype).astype(jnp.float32)
    out = h2nm @ w3                                       # (P, 1)
    return jnp.transpose(out.reshape(n, h, w, 1), (0, 3, 1, 2))


if __name__ == "__main__":
    key = jax.random.PRNGKey(0)
    kx1, kx2, kp = jax.random.split(key, 3)

    params = init_params(kp, input_nc=4, ndf=64)

    # Case 1: batch=2, 4x16x16 input; tiny tile to exercise the multi-tile grid +
    # cross-tile BatchNorm statistics (unmasked path: P is a multiple of the tile).
    x1 = jax.random.normal(kx1, (2, 4, 16, 16), jnp.float32)
    out1 = jax.block_until_ready(pixel_discriminator_forward(x1, params, tile_p=128))
    assert out1.shape == (2, 1, 16, 16), out1.shape
    ref1_tight = _reference_forward(x1, params, conv2_dtype=jnp.bfloat16,
                                    conv3_dtype=jnp.bfloat16)
    assert jnp.allclose(out1, ref1_tight, atol=2e-3, rtol=2e-3), \
        float(jnp.max(jnp.abs(out1 - ref1_tight)))
    ref1_f32 = _reference_forward(x1, params)
    assert jnp.allclose(out1, ref1_f32, atol=5e-2, rtol=5e-2), \
        float(jnp.max(jnp.abs(out1 - ref1_f32)))

    # Same input through the default (large, clamped) tile path.
    out1b = jax.block_until_ready(pixel_discriminator_forward(x1, params))
    assert out1b.shape == (2, 1, 16, 16), out1b.shape
    assert jnp.allclose(out1b, ref1_tight, atol=2e-3, rtol=2e-3), \
        float(jnp.max(jnp.abs(out1b - ref1_tight)))

    # Case 2: P not a multiple of the tile -> exercises padding + last-tile BN masking.
    x2 = jax.random.normal(kx2, (1, 4, 10, 10), jnp.float32)
    out2 = jax.block_until_ready(pixel_discriminator_forward(x2, params, tile_p=128))
    assert out2.shape == (1, 1, 10, 10), out2.shape
    ref2_tight = _reference_forward(x2, params, conv2_dtype=jnp.bfloat16,
                                    conv3_dtype=jnp.bfloat16)
    assert jnp.allclose(out2, ref2_tight, atol=2e-3, rtol=2e-3), \
        float(jnp.max(jnp.abs(out2 - ref2_tight)))
    ref2_f32 = _reference_forward(x2, params)
    assert jnp.allclose(out2, ref2_f32, atol=5e-2, rtol=5e-2), \
        float(jnp.max(jnp.abs(out2 - ref2_f32)))

    print("KERNEL_OK")
</pallas_src>

<mosaic_0001>
module attributes {stable_mosaic.version = 11 : i64} {
  func.func @kernel(%arg0: i32, %arg1: memref<4x128xf32, #tpu.memory_space<vmem>>, %arg2: memref<64x4xf32, #tpu.memory_space<vmem>>, %arg3: memref<64x1xf32, #tpu.memory_space<vmem>>, %arg4: memref<128x64xbf16, #tpu.memory_space<vmem>>, %arg5: memref<1x128x1xf32, #tpu.memory_space<vmem>>, %arg6: memref<1x128x1xf32, #tpu.memory_space<vmem>>) attributes {dimension_semantics = [#tpu.dimension_semantics<parallel>], iteration_bounds = array<i64: 4>, scalar_prefetch = 0 : i64, scratch_operands = 0 : i64, tpu.core_type = #tpu.core_type<tc>, window_params = [{transform_indices = @transform_0, window_bounds = array<i64: 4, 128>}, {pipeline_mode = #tpu.pipeline_mode<synchronous>, transform_indices = @transform_1, window_bounds = array<i64: 64, 4>}, {pipeline_mode = #tpu.pipeline_mode<synchronous>, transform_indices = @transform_2, window_bounds = array<i64: 64, 1>}, {pipeline_mode = #tpu.pipeline_mode<synchronous>, transform_indices = @transform_3, window_bounds = array<i64: 128, 64>}, {transform_indices = @transform_4, window_bounds = array<i64: 1, 128, 1>}, {transform_indices = @transform_5, window_bounds = array<i64: 1, 128, 1>}]} {
    %c0 = arith.constant 0 : index
    %c0_0 = arith.constant 0 : index
    %0 = vector.load %arg1[%c0, %c0_0] : memref<4x128xf32, #tpu.memory_space<vmem>>, vector<4x128xf32>
    %c0_1 = arith.constant 0 : index
    %c0_2 = arith.constant 0 : index
    %1 = vector.load %arg2[%c0_1, %c0_2] : memref<64x4xf32, #tpu.memory_space<vmem>>, vector<64x4xf32>
    %c0_3 = arith.constant 0 : index
    %c0_4 = arith.constant 0 : index
    %2 = vector.load %arg3[%c0_3, %c0_4] : memref<64x1xf32, #tpu.memory_space<vmem>>, vector<64x1xf32>
    %3 = vector.extract_strided_slice %1 {offsets = [0, 0], sizes = [64, 1], strides = [1, 1]} : vector<64x4xf32> to vector<64x1xf32>
    %4 = vector.extract_strided_slice %0 {offsets = [0, 0], sizes = [1, 128], strides = [1, 1]} : vector<4x128xf32> to vector<1x128xf32>
    %5 = vector.broadcast %3 : vector<64x1xf32> to vector<64x128xf32>
    %6 = vector.broadcast %4 : vector<1x128xf32> to vector<64x128xf32>
    %7 = arith.mulf %5, %6 : vector<64x128xf32>
    %8 = vector.broadcast %2 : vector<64x1xf32> to vector<64x128xf32>
    %9 = arith.addf %8, %7 : vector<64x128xf32>
    %10 = vector.extract_strided_slice %1 {offsets = [0, 1], sizes = [64, 1], strides = [1, 1]} : vector<64x4xf32> to vector<64x1xf32>
    %11 = vector.extract_strided_slice %0 {offsets = [1, 0], sizes = [1, 128], strides = [1, 1]} : vector<4x128xf32> to vector<1x128xf32>
    %12 = vector.broadcast %10 : vector<64x1xf32> to vector<64x128xf32>
    %13 = vector.broadcast %11 : vector<1x128xf32> to vector<64x128xf32>
    %14 = arith.mulf %12, %13 : vector<64x128xf32>
    %15 = arith.addf %9, %14 : vector<64x128xf32>
    %16 = vector.extract_strided_slice %1 {offsets = [0, 2], sizes = [64, 1], strides = [1, 1]} : vector<64x4xf32> to vector<64x1xf32>
    %17 = vector.extract_strided_slice %0 {offsets = [2, 0], sizes = [1, 128], strides = [1, 1]} : vector<4x128xf32> to vector<1x128xf32>
    %18 = vector.broadcast %16 : vector<64x1xf32> to vector<64x128xf32>
    %19 = vector.broadcast %17 : vector<1x128xf32> to vector<64x128xf32>
    %20 = arith.mulf %18, %19 : vector<64x128xf32>
    %21 = arith.addf %15, %20 : vector<64x128xf32>
    %22 = vector.extract_strided_slice %1 {offsets = [0, 3], sizes = [64, 1], strides = [1, 1]} : vector<64x4xf32> to vector<64x1xf32>
    %23 = vector.extract_strided_slice %0 {offsets = [3, 0], sizes = [1, 128], strides = [1, 1]} : vector<4x128xf32> to vector<1x128xf32>
    %24 = vector.broadcast %22 : vector<64x1xf32> to vector<64x128xf32>
    %25 = vector.broadcast %23 : vector<1x128xf32> to vector<64x128xf32>
    %26 = arith.mulf %24, %25 : vector<64x128xf32>
    %27 = arith.addf %21, %26 : vector<64x128xf32>
    %cst = arith.constant 0.000000e+00 : f32
    %28 = vector.broadcast %cst : f32 to vector<64x128xf32>
    %29 = arith.cmpf ogt, %27, %28 : vector<64x128xf32>
    %cst_5 = arith.constant 2.000000e-01 : f32
    %30 = vector.broadcast %cst_5 : f32 to vector<64x128xf32>
    %31 = arith.mulf %30, %27 : vector<64x128xf32>
    %32 = arith.select %29, %27, %31 : vector<64x128xi1>, vector<64x128xf32>
    %c0_6 = arith.constant 0 : index
    %c0_7 = arith.constant 0 : index
    %33 = vector.load %arg4[%c0_6, %c0_7] : memref<128x64xbf16, #tpu.memory_space<vmem>>, vector<128x64xbf16>
    %34 = arith.truncf %32 : vector<64x128xf32> to vector<64x128xbf16>
    %cst_8 = arith.constant dense<0.000000e+00> : vector<128x128xf32>
    %35 = tpu.matmul %33, %34, %cst_8 {dimension_numbers = #tpu.dot_dimension_numbers<[1], [0], [0], [1], [0, 0, 1, 1], [], []>} : vector<128x64xbf16>, vector<64x128xbf16>, vector<128x128xf32> -> vector<128x128xf32>
    %cst_9 = arith.constant dense<0.000000e+00> : vector<128xf32>
    %36 = vector.multi_reduction <add>, %35, %cst_9 [1] : vector<128x128xf32> to vector<128xf32>
    %37 = vector.shape_cast %36 : vector<128xf32> to vector<128x1xf32>
    %c0_10 = arith.constant 0 : index
    %c0_11 = arith.constant 0 : index
    %c0_12 = arith.constant 0 : index
    %38 = vector.load %arg5[%c0_10, %c0_11, %c0_12] : memref<1x128x1xf32, #tpu.memory_space<vmem>>, vector<1x128x1xf32>
    %39 = vector.shape_cast %38 : vector<1x128x1xf32> to vector<128x1xf32>
    %40 = vector.shape_cast %37 : vector<128x1xf32> to vector<1x128x1xf32>
    tpu.vector_store %arg5[%c0_10, %c0_11, %c0_12], %40 {strides = array<i32>} : memref<1x128x1xf32, #tpu.memory_space<vmem>>, vector<1x128x1xf32>,
    %41 = arith.mulf %35, %35 : vector<128x128xf32>
    %cst_13 = arith.constant dense<0.000000e+00> : vector<128xf32>
    %42 = vector.multi_reduction <add>, %41, %cst_13 [1] : vector<128x128xf32> to vector<128xf32>
    %43 = vector.shape_cast %42 : vector<128xf32> to vector<128x1xf32>
    %c0_14 = arith.constant 0 : index
    %c0_15 = arith.constant 0 : index
    %c0_16 = arith.constant 0 : index
    %44 = vector.load %arg6[%c0_14, %c0_15, %c0_16] : memref<1x128x1xf32, #tpu.memory_space<vmem>>, vector<1x128x1xf32>
    %45 = vector.shape_cast %44 : vector<1x128x1xf32> to vector<128x1xf32>
    %46 = vector.shape_cast %43 : vector<128x1xf32> to vector<1x128x1xf32>
    tpu.vector_store %arg6[%c0_14, %c0_15, %c0_16], %46 {strides = array<i32>} : memref<1x128x1xf32, #tpu.memory_space<vmem>>, vector<1x128x1xf32>,
    return
  }
  func.func @transform_0(%arg0: i32) -> (i32, i32) {
    %c0_i32 = arith.constant 0 : i32
    %c0_i32_0 = arith.constant 0 : i32
    return %c0_i32, %arg0 : i32, i32
  }
  func.func @transform_1(%arg0: i32) -> (i32, i32) {
    %c0_i32 = arith.constant 0 : i32
    %c0_i32_0 = arith.constant 0 : i32
    %c0_i32_1 = arith.constant 0 : i32
    return %c0_i32, %c0_i32_0 : i32, i32
  }
  func.func @transform_2(%arg0: i32) -> (i32, i32) {
    %c0_i32 = arith.constant 0 : i32
    %c0_i32_0 = arith.constant 0 : i32
    %c0_i32_1 = arith.constant 0 : i32
    return %c0_i32, %c0_i32_0 : i32, i32
  }
  func.func @transform_3(%arg0: i32) -> (i32, i32) {
    %c0_i32 = arith.constant 0 : i32
    %c0_i32_0 = arith.constant 0 : i32
    %c0_i32_1 = arith.constant 0 : i32
    return %c0_i32, %c0_i32_0 : i32, i32
  }
  func.func @transform_4(%arg0: i32) -> (i32, i32, i32) {
    %c0_i32 = arith.constant 0 : i32
    %c0_i32_0 = arith.constant 0 : i32
    %c0_i32_1 = arith.constant 0 : i32
    return %arg0, %c0_i32, %c0_i32_0 : i32, i32, i32
  }
  func.func @transform_5(%arg0: i32) -> (i32, i32, i32) {
    %c0_i32 = arith.constant 0 : i32
    %c0_i32_0 = arith.constant 0 : i32
    %c0_i32_1 = arith.constant 0 : i32
    return %arg0, %c0_i32, %c0_i32_0 : i32, i32, i32
  }
}

</mosaic_0001>

<bundles_post_ra>
// kernel: tpu_custom_call.1
= control target key start
LH: loop header
LB: loop body
LE: loop exit
PB: predicated region body
PF: predicated region fallthrough
CT: control target
= control target key end

     0   :  { %s1075_s18 = smov 0   ;;  %s1322_s0 = inlined_call_operand.vmem [shape: f32[4,512], index: 0, kind: input, shape index: {}]   ;;  %s1323_s1 = inlined_call_operand.vmem [shape: f32[64,4], index: 1, kind: input, shape index: {}]   ;;  %s1324_s2 = inlined_call_operand.vmem [shape: f32[64,1], index: 2, kind: input, shape index: {}]   ;;  %s1325_s3 = inlined_call_operand.vmem [shape: bf16[128,64], index: 3, kind: input, shape index: {}]   ;;  %s1326_s4 = inlined_call_operand.vmem [shape: f32[4,128,1], index: 4, kind: output, shape index: {0}]   ;;  %s1327_s5 = inlined_call_operand.vmem [shape: f32[4,128,1], index: 5, kind: output, shape index: {1}]  }
   0x1 LB: > { %s916_s19 = sadd.s32 4294967295, %s1039_s18   ;;  %p920_p0 = scmp.ge.s32.totalorder %s1039_s18, 1  ;;  %s1039_s18 = sphi %s1075_s18, %s16_s18  }
   0x2   : > { %p189_p1 = scmp.lt.s32.totalorder %s1039_s18, 5 }
   0x4   : > { %p190_p2 = pnand %p920_p0, %p189_p1 }
   0x5   : > { %v245_v0 = vld [vmem:[%s1324_s2] sm:$0xff] (!%p190_p2)  ;;  %v239_v1 = vld [vmem:[%s1323_s1 + $0x10] sm:$0xff] (!%p190_p2)  ;;  %v1041_v2 = vmov (!%p190_p2), 2   ;;  %v1042_v3 = vmov (!%p190_p2), 0   ;;  %v246_v4 = vld [vmem:[%s1324_s2 + $0x8] sm:$0xff] (!%p190_p2)  ;;  %v1043_v7 = vmov (!%p190_p2), 1   ;;  %v293_v30 = vlaneseq (!%p190_p2) }
   0x6   : > { %193 = sbr.rel (%p190_p2) target bundleno = 681 (0x2a9), region = 36  ;;  %1010 = vset.pattern.permute.xlu0 (!%p190_p2), %v1041_v2  ;;  %1002 = vset.pattern.permute.xlu1 (!%p190_p2), %v1042_v3  ;;  %v237_v5 = vld [vmem:[%s1323_s1] sm:$0xff] (!%p190_p2)  ;;  %v238_v6 = vld [vmem:[%s1323_s1 + $0x8] sm:$0xff] (!%p190_p2)  ;;  %v240_v8 = vld [vmem:[%s1323_s1 + $0x18] sm:$0xff] (!%p190_p2)  ;;  %v1044_v14 = vmov (!%p190_p2), 3   ;;  %vm593_vm0 = vcmask (!%p190_p2), 523264  }
   0x7   : > { %307 = vperm.xlu1 (!%p190_p2), %1002, %v245_v0   ;;  %414 = vperm.xlu0 (!%p190_p2), %1010, %v239_v1   ;;  %v247_v9 = vld [vmem:[%s1324_s2 + $0x10] sm:$0xff] (!%p190_p2)  ;;  %v250_v10 = vld [vmem:[%s1324_s2 + $0x28] sm:$0xff] (!%p190_p2)  ;;  %v244_v11 = vld [vmem:[%s1323_s1 + $0x38] sm:$0xff] (!%p190_p2)  ;;  %p221_p3 = scmp.lt.s32.totalorder (!%p190_p2), %s916_s19, 3  ;;  %v294_v33 = vshrl.u32 (!%p190_p2), %v293_v30, 7  ;;  %vm747_vm9 = vcmask (!%p190_p2), 7168  }
   0x8   : > { %v248_v12 = vld [vmem:[%s1324_s2 + $0x18] sm:$0xff] (!%p190_p2)  ;;  %v251_v13 = vld [vmem:[%s1324_s2 + $0x30] sm:$0xff] (!%p190_p2)  ;;  %v241_v16 = vld [vmem:[%s1323_s1 + $0x20] sm:$0xff] (!%p190_p2) }
   0x9   : > { %v243_v15 = vld [vmem:[%s1323_s1 + $0x30] sm:$0xff] (!%p190_p2)  ;;  %v242_v17 = vld [vmem:[%s1323_s1 + $0x28] sm:$0xff] (!%p190_p2)  ;;  %v249_v18 = vld [vmem:[%s1324_s2 + $0x20] sm:$0xff] (!%p190_p2)  ;;  %v295_v36 = vsub.s32 (!%p190_p2), 0, %v294_v33  ;;  %v387_v41 = vsub.s32 (!%p190_p2), 1, %v294_v33  ;;  %v439_v43 = vsub.s32 (!%p190_p2), 2, %v294_v33 }
   0xa   : > { %v252_v19 = vld [vmem:[%s1324_s2 + $0x38] sm:$0xff] (!%p190_p2)  ;;  %v1025_v20 = vld [vmem:[%s1325_s3] sm:$0xff] (!%p190_p2)   ;;  %v491_v48 = vsub.s32 (!%p190_p2), 3, %v294_v33 }
   0xb   : > { %312 = vperm.xlu1 (!%p190_p2), %1002, %v246_v4   ;;  %1011 = vset.pattern.permute.xlu0 (!%p190_p2), %v1042_v3  ;;  %v1026_v21 = vld [vmem:[%s1325_s3 + $0x20] sm:$0xff] (!%p190_p2)  }
   0xc   : > { %255 = vperm.xlu0 (!%p190_p2), %1011, %v237_v5   ;;  %966 = vmatprep.mubr.msk.bf16.mxu0 (!%p190_p2), %vm593_vm0, %v1025_v20 }
   0xd   : > { %974 = vmatprep.mubr.msk.bf16.mxu1 %vm593_vm0, %v1026_v21  ;;  %s1329_s19 = smov (!%p221_p3, %s916_s19), 3 }
   0xe   : > { %s921_s8 = sshll.u32 %s1329_s19, 2  ;;  %s944_s26 = sshll.u32 %s1329_s19, 7 }
   0xf   : > { %1003 = vset.pattern.permute.xlu1 %v1043_v7  ;;  %s224_s11 = scalar_lea.vmem %s1322_s0, %s921_s8  ;;  %s1248_s29 = scalar_lea.vmem %s1326_s4, %s944_s26 }
  0x10   : > { %358 = vperm.xlu1 %1003, %v238_v6   ;;  %260 = vperm.xlu0 %1011, %v238_v6   ;;  %v236_v37 = vld [vmem:[%s224_s11] sm:$0xf]  ;;  %s1261_s6 = scalar_lea.vmem %s1327_s5, %s944_s26 }
  0x11   : > { %v1170_v39 = vrot.slane %v236_v37, %v295_v36  ;;  %v1175_v45 = vrot.slane %v236_v37, %v387_v41  ;;  %v1178_v50 = vrot.slane %v236_v37, %v439_v43  ;;  %v1181_v56 = vrot.slane %v236_v37, %v491_v48 }
  0x14   : > { %1004 = vset.pattern.permute.xlu1 %v1042_v3  ;;  %270 = vperm.xlu0 %1011, %v240_v8  }
  0x15   : > { %265 = vperm.xlu1 %1004, %v239_v1  }
  0x18   : > { %317 = vperm.xlu0 %1011, %v247_v9  }
  0x19   : > { %1005 = vset.pattern.permute.xlu1 %v1041_v2 }
  0x1a   : > { %406 = vperm.xlu1 %1005, %v237_v5  }
  0x1c   : > { %332 = vperm.xlu0 %1011, %v250_v10  }
  0x1e   : > { %410 = vperm.xlu1 %1005, %v238_v6  }
  0x20   : > { %290 = vperm.xlu0 %1011, %v244_v11  }
  0x22   : > { %1006 = vset.pattern.permute.xlu1 %v1042_v3 }
  0x23   : > { %322 = vperm.xlu1 %1006, %v248_v12  }
  0x24   : > { %337 = vperm.xlu0 %1011, %v251_v13  }
  0x27   : > { %1007 = vset.pattern.permute.xlu1 %v1043_v7 }
  0x28   : > { %1018 = vset.pattern.permute.xlu0 %v1043_v7  ;;  %366 = vperm.xlu1 %1007, %v240_v8  }
  0x29   : > { %354 = vperm.xlu0 %1018, %v237_v5  }
  0x2c   : > { %1008 = vset.pattern.permute.xlu1 %v1044_v14 }
  0x2d   : > { %362 = vperm.xlu0 %1018, %v239_v1   ;;  %458 = vperm.xlu1 %1008, %v237_v5  }
  0x31   : > { %378 = vperm.xlu0 %1018, %v243_v15   ;;  %1009 = vset.pattern.permute.xlu1 %v1042_v3 }
  0x32   : > { %275 = vperm.xlu1 %1009, %v241_v16  }
  0x35   : > { %1020 = vset.pattern.permute.xlu0 %v1044_v14 }
  0x36   : > { %462 = vperm.xlu0 %1020, %v238_v6   ;;  %280 = vperm.xlu1 %1009, %v242_v17  }
  0x3a   : > { %466 = vperm.xlu0 %1020, %v239_v1   ;;  %1012 = vset.pattern.permute.xlu1 %v1041_v2 }
  0x3b   : > { %418 = vperm.xlu1 %1012, %v240_v8  }
  0x3e   : > { %478 = vperm.xlu0 %1020, %v242_v17  }
  0x3f   : > { %1013 = vset.pattern.permute.xlu1 %v1042_v3 }
  0x40   : > { %327 = vperm.xlu1 %1013, %v249_v18  }
  0x42   : > { %482 = vperm.xlu0 %1020, %v243_v15  }
  0x44   : > { %1014 = vset.pattern.permute.xlu1 %v1043_v7 }
  0x45   : > { %370 = vperm.xlu1 %1014, %v241_v16  }
  0x49   : > { %374 = vperm.xlu1 %1014, %v242_v17  }
  0x4d   : > { %1015 = vset.pattern.permute.xlu1 %v1044_v14 }
  0x4e   : > { %470 = vperm.xlu1 %1015, %v240_v8  }
  0x52   : > { %1016 = vset.pattern.permute.xlu1 %v1042_v3 }
  0x53   : > { %285 = vperm.xlu1 %1016, %v243_v15  }
  0x57   : > { %1017 = vset.pattern.permute.xlu1 %v1041_v2 }
  0x58   : > { %422 = vperm.xlu1 %1017, %v241_v16  }
  0x5c   : > { %426 = vperm.xlu1 %1017, %v242_v17  }
  0x60   : > { %1019 = vset.pattern.permute.xlu1 %v1042_v3 }
  0x61   : > { %342 = vperm.xlu1 %1019, %v252_v19  }
  0x65   : > { %1021 = vset.pattern.permute.xlu1 %v1043_v7 }
  0x66   : > { %382 = vperm.xlu1 %1021, %v244_v11  }
  0x6a   : > { %1022 = vset.pattern.permute.xlu1 %v1044_v14 }
  0x6b   : > { %474 = vperm.xlu1 %1022, %v241_v16  }
  0x6f   : > { %1023 = vset.pattern.permute.xlu1 %v1041_v2 }
  0x70   : > { %430 = vperm.xlu1 %1023, %v243_v15  }
  0x74   : > { %434 = vperm.xlu1 %1023, %v244_v11  }
  0x78   : > { %1024 = vset.pattern.permute.xlu1 %v1044_v14 }
  0x79   : > { %486 = vperm.xlu1 %1024, %v244_v11  }
  0x86   : > { %v308_v22 = vpop.permute.xlu1 %307  ;;  %v1152_v23 = vpop.permute.xlu0 %414 }
  0x87   : > { %v443_v20 = vmul.f32 %v1178_v50, %v1152_v23 }
  0x8a   : > { %v313_v24 = vpop.permute.xlu1 %312 }
  0x8b   : > { %v256_v25 = vpop.permute.xlu0 %255 }
  0x8c   : > { %v297_v44 = vmul.f32 %v1170_v39, %v256_v25 }
  0x8e   : > { %v345_v51 = vadd.f32 %v308_v22, %v297_v44 }
  0x8f   : > { %v359_v26 = vpop.permute.xlu1 %358  ;;  %v261_v27 = vpop.permute.xlu0 %260 }
  0x90   : > { %v298_v52 = vmul.f32 %v1170_v39, %v261_v27  ;;  %v390_v63 = vmul.f32 %v1175_v45, %v359_v26 }
  0x92   : > { %v346_v58 = vadd.f32 %v313_v24, %v298_v52 }
  0x93   : > { %v1156_v28 = vpop.permute.xlu0 %270 }
  0x94   : > { %v266_v29 = vpop.permute.xlu1 %265  ;;  %v398_v1 = vadd.f32 %v390_v63, %v346_v58  ;;  %v300_v21 = vmul.f32 %v1170_v39, %v1156_v28 }
  0x95   : > { %v299_v15 = vmul.f32 %v1170_v39, %v266_v29 }
  0x97   : > { %v318_v31 = vpop.permute.xlu0 %317 }
  0x98   : > { %v347_v17 = vadd.f32 %v318_v31, %v299_v15 }
  0x99   : > { %v407_v32 = vpop.permute.xlu1 %406 }
  0x9a   : > { %v441_v57 = vmul.f32 %v1178_v50, %v407_v32 }
  0x9b   : > { %v1163_v34 = vpop.permute.xlu0 %332 }
  0x9d   : > { %v411_v35 = vpop.permute.xlu1 %410 }
  0x9e   : > { %v442_v0 = vmul.f32 %v1178_v50, %v411_v35 }
  0x9f   : > { %v1168_v38 = vpop.permute.xlu0 %290 }
  0xa0   : > { %v450_v5 = vadd.f32 %v442_v0, %v398_v1 }
  0xa2   : > { %v323_v40 = vpop.permute.xlu1 %322 }
  0xa3   : > { %v1172_v42 = vpop.permute.xlu0 %337  ;;  %v348_v27 = vadd.f32 %v323_v40, %v300_v21 }
  0xa7   : > { %v367_v46 = vpop.permute.xlu1 %366 }
  0xa8   : > { %v355_v47 = vpop.permute.xlu0 %354  ;;  %v392_v24 = vmul.f32 %v1175_v45, %v367_v46 }
  0xa9   : > { %v389_v49 = vmul.f32 %v1175_v45, %v355_v47 }
  0xaa   : > { %v400_v32 = vadd.f32 %v392_v24, %v348_v27 }
  0xab   : > { %v397_v53 = vadd.f32 %v389_v49, %v345_v51 }
  0xac   : > { %v363_v54 = vpop.permute.xlu0 %362  ;;  %v459_v55 = vpop.permute.xlu1 %458 }
  0xad   : > { %v449_v59 = vadd.f32 %v441_v57, %v397_v53  ;;  %v493_v60 = vmul.f32 %v1181_v56, %v459_v55  ;;  %v391_v16 = vmul.f32 %v1175_v45, %v363_v54 }
  0xaf   : > { %v501_v2 = vadd.f32 %v493_v60, %v449_v59  ;;  %v399_v22 = vadd.f32 %v391_v16, %v347_v17  ;;  %v304_v16 = vmul.f32 %v1170_v39, %v1168_v38 }
  0xb0   : > { %v379_v61 = vpop.permute.xlu0 %378 }
  0xb1   : > { %v1185_v62 = vpop.permute.xlu1 %275  ;;  %v517_v7 = vmul.f32 0.2, %v501_v2  ;;  %vm509_vm1 = vcmp.gt.f32.partialorder %v501_v2, 0.0  ;;  %v451_v29 = vadd.f32 %v443_v20, %v399_v22  ;;  %v395_v43 = vmul.f32 %v1175_v45, %v379_v61 }
  0xb3   : > { %v525_v11 = vsel %vm509_vm1, %v501_v2, %v517_v7 }
  0xb5   : > { %v463_v3 = vpop.permute.xlu0 %462  ;;  %v281_v4 = vpop.permute.xlu1 %280 }
  0xb6   : > { %v494_v6 = vmul.f32 %v1181_v56, %v463_v3  ;;  %v302_v53 = vmul.f32 %v1170_v39, %v281_v4 }
  0xb8   : > { %v502_v8 = vadd.f32 %v494_v6, %v450_v5  ;;  %v350_v57 = vadd.f32 %v1163_v34, %v302_v53 }
  0xb9   : > { %v467_v19 = vpop.permute.xlu0 %466 }
  0xba   : > { %vm510_vm2 = vcmp.gt.f32.partialorder %v502_v8, 0.0  ;;  %v518_v9 = vmul.f32 0.2, %v502_v8  ;;  %v419_v10 = vpop.permute.xlu1 %418  ;;  %v495_v25 = vmul.f32 %v1181_v56, %v467_v19 }
  0xbb   : > { %v444_v30 = vmul.f32 %v1178_v50, %v419_v10 }
  0xbc   : > { %v526_v12 = vsel %vm510_vm2, %v502_v8, %v518_v9  ;;  %v503_v31 = vadd.f32 %v495_v25, %v451_v29 }
  0xbd   : > { %v549_v13 = vpack.c.bf16 %v526_v12, %v525_v11  ;;  %v452_v35 = vadd.f32 %v444_v30, %v400_v32  ;;  %v479_v59 = vpop.permute.xlu0 %478 }
  0xbe   : > { %v519_v23 = vmul.f32 0.2, %v503_v31  ;;  %vm511_vm3 = vcmp.gt.f32.partialorder %v503_v31, 0.0  ;;  %v498_v0 = vmul.f32 %v1181_v56, %v479_v59 }
  0xbf   : > { %v328_v14 = vpop.permute.xlu1 %327  ;;  %958 = vmatprep.subr.bf16.mxu0 %v549_v13  ;;  %982 = vmatprep.subr.bf16.mxu1 %v549_v13 }
  0xc0   : > { %959 = vmatpush3.bf16.msra.mxu0 %v549_v13  ;;  %986 = vmatpush3.bf16.msra.mxu1 %v549_v13  ;;  %v527_v40 = vsel %vm511_vm3, %v503_v31, %v519_v23  ;;  %v1032_v23 = vld [vmem:[%s1325_s3 + $0x38] sm:$0xff]  }
  0xc1   : > { %v483_v15 = vpop.permute.xlu0 %482 }
  0xc2   : > { %v499_v21 = vmul.f32 %v1181_v56, %v483_v15 }
  0xc4   : > { %v371_v18 = vpop.permute.xlu1 %370 }
  0xc5   : > { %v393_v61 = vmul.f32 %v1175_v45, %v371_v18 }
  0xc8   : > { %v375_v26 = vpop.permute.xlu1 %374 }
  0xc9   : > { %v394_v54 = vmul.f32 %v1175_v45, %v375_v26 }
  0xcb   : > { %v402_v60 = vadd.f32 %v394_v54, %v350_v57 }
  0xcd   : > { %v471_v33 = vpop.permute.xlu1 %470 }
  0xce   : > { %v496_v36 = vmul.f32 %v1181_v56, %v471_v33  ;;  %v1028_v33 = vld [vmem:[%s1325_s3 + $0x28] sm:$0xff]  }
  0xd0   : > { %v504_v37 = vadd.f32 %v496_v36, %v452_v35  ;;  %v1031_v35 = vld [vmem:[%s1325_s3 + $0x30] sm:$0xff]   ;;  %v1030_v36 = vld [vmem:[%s1325_s3 + $0x18] sm:$0xff]  }
  0xd2   : > { %vm512_vm4 = vcmp.gt.f32.partialorder %v504_v37, 0.0  ;;  %v520_v28 = vmul.f32 0.2, %v504_v37  ;;  %v286_v41 = vpop.permute.xlu1 %285 }
  0xd3   : > { %v303_v44 = vmul.f32 %v1170_v39, %v286_v41 }
  0xd4   : > { %v528_v46 = vsel %vm512_vm4, %v504_v37, %v520_v28 }
  0xd5   : > { %v351_v47 = vadd.f32 %v1172_v42, %v303_v44  ;;  %v550_v48 = vpack.c.bf16 %v528_v46, %v527_v40  ;;  %v301_v42 = vmul.f32 %v1170_v39, %v1185_v62 }
  0xd7   : > { %v423_v49 = vpop.permute.xlu1 %422  ;;  %960 = vmatprep.subr.bf16.mxu0 %v550_v48  ;;  %983 = vmatprep.subr.bf16.mxu1 %v550_v48  ;;  %v403_v51 = vadd.f32 %v395_v43, %v351_v47  ;;  %v349_v2 = vadd.f32 %v328_v14, %v301_v42 }
  0xd8   : > { %961 = vmatpush3.bf16.msra.mxu0 %v550_v48  ;;  %987 = vmatpush3.bf16.msra.mxu1 %v550_v48  ;;  %v445_v3 = vmul.f32 %v1178_v50, %v423_v49 }
  0xd9   : > { %v401_v4 = vadd.f32 %v393_v61, %v349_v2 }
  0xdb   : > { %v427_v52 = vpop.permute.xlu1 %426  ;;  %v453_v34 = vadd.f32 %v445_v3, %v401_v4 }
  0xdc   : > { %v446_v58 = vmul.f32 %v1178_v50, %v427_v52 }
  0xde   : > { %v454_v63 = vadd.f32 %v446_v58, %v402_v60 }
  0xe0   : > { %v343_v55 = vpop.permute.xlu1 %342  ;;  %v506_v5 = vadd.f32 %v498_v0, %v454_v63 }
  0xe1   : > { %v352_v20 = vadd.f32 %v343_v55, %v304_v16 }
  0xe2   : > { %v522_v8 = vmul.f32 0.2, %v506_v5  ;;  %vm514_vm5 = vcmp.gt.f32.partialorder %v506_v5, 0.0 }
  0xe4   : > { %v530_v12 = vsel %vm514_vm5, %v506_v5, %v522_v8 }
  0xe5   : > { %v383_v1 = vpop.permute.xlu1 %382 }
  0xe6   : > { %v396_v17 = vmul.f32 %v1175_v45, %v383_v1 }
  0xe8   : > { %v404_v24 = vadd.f32 %v396_v17, %v352_v20 }
  0xea   : > { %v475_v6 = vpop.permute.xlu1 %474 }
  0xeb   : > { %v497_v7 = vmul.f32 %v1181_v56, %v475_v6 }
  0xed   : > { %v505_v9 = vadd.f32 %v497_v7, %v453_v34 }
  0xef   : > { %vm513_vm6 = vcmp.gt.f32.partialorder %v505_v9, 0.0  ;;  %v521_v62 = vmul.f32 0.2, %v505_v9  ;;  %v431_v10 = vpop.permute.xlu1 %430 }
  0xf0   : > { %v447_v11 = vmul.f32 %v1178_v50, %v431_v10 }
  0xf1   : > { %v529_v13 = vsel %vm513_vm6, %v505_v9, %v521_v62 }
  0xf2   : > { %v551_v14 = vpack.c.bf16 %v530_v12, %v529_v13  ;;  %v455_v18 = vadd.f32 %v447_v11, %v403_v51 }
  0xf3   : > { %v435_v19 = vpop.permute.xlu1 %434 }
  0xf4   : > { %962 = vmatprep.subr.bf16.mxu0 %v551_v14  ;;  %984 = vmatprep.subr.bf16.mxu1 %v551_v14  ;;  %v448_v22 = vmul.f32 %v1178_v50, %v435_v19  ;;  %v507_v25 = vadd.f32 %v499_v21, %v455_v18  ;;  %v1027_v50 = vld [vmem:[%s1325_s3 + $0x8] sm:$0xff]  }
  0xf5   : > { %963 = vmatpush3.bf16.msra.mxu0 %v551_v14  ;;  %988 = vmatpush3.bf16.msra.mxu1 %v551_v14 }
  0xf6   : > { %v456_v27 = vadd.f32 %v448_v22, %v404_v24  ;;  %v523_v38 = vmul.f32 0.2, %v507_v25  ;;  %vm515_vm7 = vcmp.gt.f32.partialorder %v507_v25, 0.0 }
  0xf8   : > { %v487_v26 = vpop.permute.xlu1 %486  ;;  %v531_v32 = vsel %vm515_vm7, %v507_v25, %v523_v38 }
  0xf9   : > { %v500_v29 = vmul.f32 %v1181_v56, %v487_v26  ;;  %v1029_v56 = vld [vmem:[%s1325_s3 + $0x10] sm:$0xff]  }
  0xfb   : > { %v508_v39 = vadd.f32 %v500_v29, %v456_v27 }
  0xfd   : > { %vm516_vm8 = vcmp.gt.f32.partialorder %v508_v39, 0.0  ;;  %v524_v45 = vmul.f32 0.2, %v508_v39 }
  0xff   : > { %v532_v30 = vsel %vm516_vm8, %v508_v39, %v524_v45 }
 0x100   : > { %v552_v31 = vpack.c.bf16 %v532_v30, %v531_v32 }
 0x102   : > { %964 = vmatprep.subr.bf16.mxu0 %v552_v31  ;;  %985 = vmatprep.subr.bf16.mxu1 %v552_v31 }
 0x103   : > { %965 = vmatpush3.bf16.msra.mxu0 %v552_v31  ;;  %989 = vmatpush3.bf16.msra.mxu1 %v552_v31 }
 0x106   : > { %967 = vmatmul.mubr.msk.bf16.vlgmr.msra.gmra.mrb[0].mxu0 %vm593_vm0, %v1027_v50  ;;  %975 = vmatmul.mubr.msk.bf16.vlgmr.msra.gmra.mrb[0].mxu1 %vm593_vm0, %v1028_v33 }
 0x107   : > { %970 = vmatprep.mubr.msk.bf16.mxu0 %vm593_vm0, %v1029_v56  ;;  %978 = vmatprep.mubr.msk.bf16.mxu1 %vm593_vm0, %v1031_v35 }
 0x10e   : > { %971 = vmatmul.mubr.msk.bf16.gmra.mrb[4].mxu0 %vm593_vm0, %v1030_v36  ;;  %979 = vmatmul.mubr.msk.bf16.gmra.mrb[4].mxu1 %vm593_vm0, %v1032_v23 }
 0x1d9   : > { %v968_v37 = vpop.f32.mrb[0].mxu0  ;;  %v976_v28 = vpop.f32.mrb[0].mxu1 }
 0x1da   : > { %735 = vadd.xlane.f32.xlu1 %v976_v28  ;;  %719 = vadd.xlane.f32.xlu0 %v968_v37  ;;  %v652_v41 = vpop.f32.mrb[1].mxu0  ;;  %v684_v43 = vpop.f32.mrb[1].mxu1  ;;  %v766_v48 = vmul.f32 %v968_v37, %v968_v37  ;;  %v774_v57 = vmul.f32 %v976_v28, %v976_v28 }
 0x1db   : > { %v969_v44 = vpop.f32.mrb[2].mxu0  ;;  %v977_v40 = vpop.f32.mrb[2].mxu1  ;;  %v764_v42 = vmul.f32 %v652_v41, %v652_v41  ;;  %v772_v63 = vmul.f32 %v684_v43, %v684_v43 }
 0x1dc   : > { %v655_v46 = vpop.f32.mrb[3].mxu0  ;;  %v687_v47 = vpop.f32.mrb[3].mxu1  ;;  %v767_v60 = vmul.f32 %v969_v44, %v969_v44  ;;  %v775_v61 = vmul.f32 %v977_v40, %v977_v40 }
 0x1dd   : > { %v765_v0 = vmul.f32 %v655_v46, %v655_v46  ;;  %v773_v1 = vmul.f32 %v687_v47, %v687_v47 }
 0x1de   : > { %731 = vadd.xlane.f32.xlu1 %v684_v43  ;;  %715 = vadd.xlane.f32.xlu0 %v652_v41 }
 0x1e1   : > { %v972_v49 = vpop.f32.mrb[4].mxu0  ;;  %v980_v51 = vpop.f32.mrb[4].mxu1 }
 0x1e2   : > { %784 = vadd.xlane.f32.xlu1 %v766_v48  ;;  %721 = vadd.xlane.f32.xlu0 %v969_v44  ;;  %v668_v52 = vpop.f32.mrb[5].mxu0  ;;  %v700_v53 = vpop.f32.mrb[5].mxu1  ;;  %v770_v2 = vmul.f32 %v972_v49, %v972_v49  ;;  %v778_v34 = vmul.f32 %v980_v51, %v980_v51 }
 0x1e3   : > { %v973_v54 = vpop.f32.mrb[6].mxu0  ;;  %v981_v55 = vpop.f32.mrb[6].mxu1  ;;  %v768_v3 = vmul.f32 %v668_v52, %v668_v52  ;;  %v776_v4 = vmul.f32 %v700_v53, %v700_v53 }
 0x1e4   : > { %v671_v58 = vpop.f32.mrb[7].mxu0  ;;  %v703_v59 = vpop.f32.mrb[7].mxu1  ;;  %v771_v5 = vmul.f32 %v973_v54, %v973_v54  ;;  %v779_v8 = vmul.f32 %v981_v55, %v981_v55 }
 0x1e5   : > { %v769_v6 = vmul.f32 %v671_v58, %v671_v58  ;;  %v777_v7 = vmul.f32 %v703_v59, %v703_v59 }
 0x1e6   : > { %800 = vadd.xlane.f32.xlu1 %v774_v57  ;;  %737 = vadd.xlane.f32.xlu0 %v977_v40 }
 0x1ea   : > { %733 = vadd.xlane.f32.xlu0 %v687_v47  ;;  %717 = vadd.xlane.f32.xlu1 %v655_v46 }
 0x1ee   : > { %786 = vadd.xlane.f32.xlu0 %v767_v60  ;;  %780 = vadd.xlane.f32.xlu1 %v764_v42 }
 0x1f2   : > { %802 = vadd.xlane.f32.xlu0 %v775_v61  ;;  %796 = vadd.xlane.f32.xlu1 %v772_v63 }
 0x1f6   : > { %782 = vadd.xlane.f32.xlu0 %v765_v0  ;;  %727 = vadd.xlane.f32.xlu1 %v972_v49 }
 0x1fa   : > { %798 = vadd.xlane.f32.xlu0 %v773_v1  ;;  %743 = vadd.xlane.f32.xlu1 %v980_v51 }
 0x1fe   : > { %723 = vadd.xlane.f32.xlu1 %v668_v52  ;;  %729 = vadd.xlane.f32.xlu0 %v973_v54 }
 0x202   : > { %739 = vadd.xlane.f32.xlu1 %v700_v53  ;;  %745 = vadd.xlane.f32.xlu0 %v981_v55 }
 0x206   : > { %792 = vadd.xlane.f32.xlu1 %v770_v2  ;;  %725 = vadd.xlane.f32.xlu0 %v671_v58 }
 0x20a   : > { %788 = vadd.xlane.f32.xlu1 %v768_v3  ;;  %741 = vadd.xlane.f32.xlu0 %v703_v59 }
 0x20e   : > { %804 = vadd.xlane.f32.xlu1 %v776_v4  ;;  %794 = vadd.xlane.f32.xlu0 %v771_v5 }
 0x212   : > { %808 = vadd.xlane.f32.xlu1 %v778_v34  ;;  %790 = vadd.xlane.f32.xlu0 %v769_v6 }
 0x216   : > { %806 = vadd.xlane.f32.xlu0 %v777_v7 }
 0x21a   : > { %810 = vadd.xlane.f32.xlu0 %v779_v8 }
 0x267   : > { %v736_v9 = vpop.xlane.xlu1 %735  ;;  %v720_v62 = vpop.xlane.xlu0 %719 }
 0x268   : > { %758 = vst.msk [vmem:[%s1248_s29 + $0x50] sm:$0xff] %vm747_vm9, %v736_v9  ;;  %750 = vst.msk [vmem:[%s1248_s29 + $0x10] sm:$0xff] %vm747_vm9, %v720_v62 }
 0x26b   : > { %v732_v10 = vpop.xlane.xlu1 %731  ;;  %v716_v11 = vpop.xlane.xlu0 %715 }
 0x26c   : > { %756 = vst.msk [vmem:[%s1248_s29 + $0x40] sm:$0xff] %vm747_vm9, %v732_v10  ;;  %748 = vst.msk [vmem:[%s1248_s29] sm:$0xff] %vm747_vm9, %v716_v11 }
 0x26f   : > { %v785_v12 = vpop.xlane.xlu1 %784  ;;  %v722_v13 = vpop.xlane.xlu0 %721 }
 0x270   : > { %814 = vst.msk [vmem:[%s1261_s6 + $0x10] sm:$0xff] %vm747_vm9, %v785_v12  ;;  %751 = vst.msk [vmem:[%s1248_s29 + $0x18] sm:$0xff] %vm747_vm9, %v722_v13 }
 0x273   : > { %v801_v15 = vpop.xlane.xlu1 %800  ;;  %v738_v14 = vpop.xlane.xlu0 %737 }
 0x274   : > { %822 = vst.msk [vmem:[%s1261_s6 + $0x50] sm:$0xff] %vm747_vm9, %v801_v15  ;;  %759 = vst.msk [vmem:[%s1248_s29 + $0x58] sm:$0xff] %vm747_vm9, %v738_v14 }
 0x277   : > { %v734_v16 = vpop.xlane.xlu0 %733  ;;  %v718_v17 = vpop.xlane.xlu1 %717 }
 0x278   : > { %757 = vst.msk [vmem:[%s1248_s29 + $0x48] sm:$0xff] %vm747_vm9, %v734_v16  ;;  %749 = vst.msk [vmem:[%s1248_s29 + $0x8] sm:$0xff] %vm747_vm9, %v718_v17 }
 0x27b   : > { %v787_v18 = vpop.xlane.xlu0 %786  ;;  %v781_v19 = vpop.xlane.xlu1 %780 }
 0x27c   : > { %815 = vst.msk [vmem:[%s1261_s6 + $0x18] sm:$0xff] %vm747_vm9, %v787_v18  ;;  %812 = vst.msk [vmem:[%s1261_s6] sm:$0xff] %vm747_vm9, %v781_v19 }
 0x27f   : > { %v803_v20 = vpop.xlane.xlu0 %802  ;;  %v797_v21 = vpop.xlane.xlu1 %796 }
 0x280   : > { %823 = vst.msk [vmem:[%s1261_s6 + $0x58] sm:$0xff] %vm747_vm9, %v803_v20  ;;  %820 = vst.msk [vmem:[%s1261_s6 + $0x40] sm:$0xff] %vm747_vm9, %v797_v21 }
 0x283   : > { %v783_v22 = vpop.xlane.xlu0 %782  ;;  %v728_v24 = vpop.xlane.xlu1 %727 }
 0x284   : > { %813 = vst.msk [vmem:[%s1261_s6 + $0x8] sm:$0xff] %vm747_vm9, %v783_v22  ;;  %754 = vst.msk [vmem:[%s1248_s29 + $0x30] sm:$0xff] %vm747_vm9, %v728_v24 }
 0x287   : > { %v799_v25 = vpop.xlane.xlu0 %798  ;;  %v744_v26 = vpop.xlane.xlu1 %743 }
 0x288   : > { %821 = vst.msk [vmem:[%s1261_s6 + $0x48] sm:$0xff] %vm747_vm9, %v799_v25  ;;  %762 = vst.msk [vmem:[%s1248_s29 + $0x70] sm:$0xff] %vm747_vm9, %v744_v26 }
 0x28b   : > { %v724_v27 = vpop.xlane.xlu1 %723  ;;  %v730_v29 = vpop.xlane.xlu0 %729 }
 0x28c   : > { %752 = vst.msk [vmem:[%s1248_s29 + $0x20] sm:$0xff] %vm747_vm9, %v724_v27  ;;  %755 = vst.msk [vmem:[%s1248_s29 + $0x38] sm:$0xff] %vm747_vm9, %v730_v29 }
 0x28f   : > { %v740_v38 = vpop.xlane.xlu1 %739  ;;  %v746_v39 = vpop.xlane.xlu0 %745 }
 0x290   : > { %760 = vst.msk [vmem:[%s1248_s29 + $0x60] sm:$0xff] %vm747_vm9, %v740_v38  ;;  %763 = vst.msk [vmem:[%s1248_s29 + $0x78] sm:$0xff] %vm747_vm9, %v746_v39 }
 0x293   : > { %v793_v45 = vpop.xlane.xlu1 %792  ;;  %v726_v30 = vpop.xlane.xlu0 %725 }
 0x294   : > { %818 = vst.msk [vmem:[%s1261_s6 + $0x30] sm:$0xff] %vm747_vm9, %v793_v45  ;;  %753 = vst.msk [vmem:[%s1248_s29 + $0x28] sm:$0xff] %vm747_vm9, %v726_v30 }
 0x297   : > { %v789_v32 = vpop.xlane.xlu1 %788  ;;  %v742_v31 = vpop.xlane.xlu0 %741 }
 0x298   : > { %816 = vst.msk [vmem:[%s1261_s6 + $0x20] sm:$0xff] %vm747_vm9, %v789_v32  ;;  %761 = vst.msk [vmem:[%s1248_s29 + $0x68] sm:$0xff] %vm747_vm9, %v742_v31 }
 0x29b   : > { %v805_v50 = vpop.xlane.xlu1 %804  ;;  %v795_v33 = vpop.xlane.xlu0 %794 }
 0x29c   : > { %824 = vst.msk [vmem:[%s1261_s6 + $0x60] sm:$0xff] %vm747_vm9, %v805_v50  ;;  %819 = vst.msk [vmem:[%s1261_s6 + $0x38] sm:$0xff] %vm747_vm9, %v795_v33 }
 0x29f   : > { %v809_v56 = vpop.xlane.xlu1 %808  ;;  %v791_v35 = vpop.xlane.xlu0 %790 }
 0x2a0   : > { %826 = vst.msk [vmem:[%s1261_s6 + $0x70] sm:$0xff] %vm747_vm9, %v809_v56  ;;  %817 = vst.msk [vmem:[%s1261_s6 + $0x28] sm:$0xff] %vm747_vm9, %v791_v35 }
 0x2a3   : > { %v807_v36 = vpop.xlane.xlu0 %806 }
 0x2a4   : > { %825 = vst.msk [vmem:[%s1261_s6 + $0x68] sm:$0xff] %vm747_vm9, %v807_v36 }
 0x2a7   : > { %v811_v23 = vpop.xlane.xlu0 %810 }
 0x2a8   : > { %827 = vst.msk [vmem:[%s1261_s6 + $0x78] sm:$0xff] %vm747_vm9, %v811_v23 }
 0x2a9 PF: > { %s16_s18 = sadd.s32 1, %s1039_s18  }
 0x2aa   : > { %p13_p4 = scmp.ge.s32.totalorder %s16_s18, 6  }
 0x2ac   :  { %15 = sbr.rel (!%p13_p4) target bundleno = 1 (0x1), region = 78 }

</bundles_post_ra>
